<compile_context>
chip_gen: v6e
topology: v6e:2x2x1
jax: 0.10.0
libtpu: 0.0.40
codegen_flags: <defaults>
</compile_context>

<pallas_src>
import functools
import math
import re

import jax
import jax.numpy as jnp
from jax.experimental import pallas as pl
from jax.experimental.pallas import tpu as pltpu


def _round_up(x, m):
    return ((x + m - 1) // m) * m


def _tpu_major_version():
    """Best-effort TPU generation detection (None if not determinable)."""
    try:
        kind = jax.devices()[0].device_kind.lower()
    except Exception:
        return None
    m = re.search(r"(\d+)", kind)
    return int(m.group(1)) if m else None


def _actor_kernel(max_action, n_hidden, ew_dtype, *refs):
    """Fused MLP forward over one (TB, state_dim) batch tile.

    refs = (s_ref, w0, b0, w1, b1, ..., w_out, b_out, out_ref)

    * layer 0 runs fully in f32 (tiny K; keeps raw state features exact),
    * hidden layers use bf16 weights on the MXU with f32 accumulation and do
      bias-add / ReLU / activation-carry in `ew_dtype`
      (bf16 on v6e/v7x which have a bf16 VPU, f32 on v5e and older),
    * final layer accumulates in f32; tanh + max_action scaling in f32.
    """
    s_ref = refs[0]
    out_ref = refs[-1]
    p = refs[1:-1]  # flat (w, b) pairs

    # ---- input layer (all-f32) ----
    x = s_ref[...]                                        # (TB, state_dim) f32
    y = jnp.dot(x, p[0][...], preferred_element_type=jnp.float32)
    x = jnp.maximum(y + p[1][...], 0.0).astype(ew_dtype)

    # ---- hidden layers: Linear -> ReLU ----
    # TODO(synk): for very deep nets, stack the (128,128) hidden weights and
    # iterate with lax.fori_loop; for layer_num <= 4 the unrolled loop is fine.
    idx = 2
    for _ in range(n_hidden):
        w = p[idx][...]                                   # bf16 (MXU input)
        b = p[idx + 1][...]                               # ew_dtype
        idx += 2
        y = jnp.dot(x.astype(w.dtype), w, preferred_element_type=jnp.float32)
        x = jnp.maximum(y.astype(ew_dtype) + b, 0.0)      # bias+ReLU in ew_dtype

    # ---- output layer (lane-padded to 128): Linear -> max_action * tanh ----
    w = p[idx][...]                                       # bf16
    b = p[idx + 1][...]                                   # f32
    logits = jnp.dot(x.astype(w.dtype), w, preferred_element_type=jnp.float32) + b
    out_ref[...] = (max_action * jnp.tanh(logits)).astype(out_ref.dtype)


def actor_forward(s, params, max_action, *, tile_batch=1024,
                  mxu_dtype=jnp.bfloat16, ew_dtype=None, out_dtype=None):
    """Run the fused Actor MLP as a batch-tiled Pallas call.

    s:       (batch, *state_shape) float array
    params:  flat list [w0, b0, w1, b1, ..., w_out, b_out]
             with w_i shaped (in, out) and b_i shaped (1, out), f32.
    Returns (logits, None) matching the PyTorch module.
    """
    batch = s.shape[0]
    s2d = s.reshape(batch, -1).astype(jnp.float32)
    state_dim = s2d.shape[1]
    hidden = params[0].shape[1]
    action_dim = params[-1].shape[-1]
    n_linear = len(params) // 2
    n_hidden = n_linear - 2

    major = _tpu_major_version()
    if ew_dtype is None:
        # v6e / v7x have a bf16 VPU -> do elementwise work / carry activations
        # in bf16; v5e and older keep the f32 elementwise path.
        ew_dtype = jnp.bfloat16 if (major is not None and major >= 6) else jnp.float32
    if out_dtype is None:
        # v5e: f32 output writeback is the dominant HBM stream at ~0.82 TB/s;
        # emit bf16 (lane width stays 128 -> unmasked vst) and upcast outside.
        out_dtype = jnp.bfloat16 if major == 5 else jnp.float32

    # --- lane-dense output: pad final layer to a multiple of 128 lanes ---
    a_pad = _round_up(action_dim, 128)
    w_out = jnp.zeros((hidden, a_pad), jnp.float32).at[:, :action_dim].set(params[-2])
    b_out = jnp.zeros((1, a_pad), jnp.float32).at[:, :action_dim].set(params[-1])

    # --- parameter dtypes ---
    kparams = [params[0].astype(jnp.float32),        # layer 0 weight: f32
               params[1].astype(jnp.float32)]        # layer 0 bias:   f32
    for i in range(1, n_linear - 1):
        kparams.append(params[2 * i].astype(mxu_dtype))        # hidden W -> bf16
        kparams.append(params[2 * i + 1].astype(ew_dtype))     # hidden b -> ew
    kparams.append(w_out.astype(mxu_dtype))                    # output W -> bf16
    kparams.append(b_out)                                      # output b stays f32

    # --- batch tiling ---
    # TB is a multiple of 8 sublanes, capped at tile_batch (default 1024, a
    # multiple of 256). When batch > 8 force at least 2 grid steps so that on
    # v7x the "parallel" batch axis is sharded across both TensorCores.
    if batch > 8:
        tb = min(int(tile_batch), _round_up((batch + 1) // 2, 8))
    else:
        tb = min(int(tile_batch), _round_up(batch, 8))
    tb = max(tb, 8)
    b_pad = _round_up(batch, tb)
    if b_pad != batch:
        s2d = jnp.pad(s2d, ((0, b_pad - batch), (0, 0)))
    grid = (b_pad // tb,)

    in_specs = [pl.BlockSpec((tb, state_dim), lambda i: (i, 0))]
    # Weights / biases: full-array block, constant index_map -> VMEM-resident
    # across all grid steps. Single-buffer them (the block never changes);
    # fall back to the default spec if pipeline_mode is unavailable.
    for prm in kparams:
        try:
            spec = pl.BlockSpec(prm.shape, lambda i: (0, 0),
                                pipeline_mode=pl.Buffered(1))
        except (TypeError, AttributeError):
            spec = pl.BlockSpec(prm.shape, lambda i: (0, 0))
        in_specs.append(spec)
    out_specs = pl.BlockSpec((tb, a_pad), lambda i: (i, 0))

    flops = 2 * b_pad * (state_dim * hidden + hidden * hidden * n_hidden + hidden * a_pad)
    param_bytes = sum(int(p.size) * p.dtype.itemsize for p in kparams)
    bytes_accessed = (int(s2d.size) * 4
                      + b_pad * a_pad * jnp.dtype(out_dtype).itemsize
                      + param_bytes)

    # NOTE: max_action is baked in as a static constant; each distinct value
    # triggers a retrace/recompile (fine for a fixed policy head).
    kernel = functools.partial(_actor_kernel, float(max_action), n_hidden, ew_dtype)

    out = pl.pallas_call(
        kernel,
        out_shape=jax.ShapeDtypeStruct((b_pad, a_pad), out_dtype),
        grid_spec=pltpu.PrefetchScalarGridSpec(
            num_scalar_prefetch=0,
            grid=grid,
            in_specs=in_specs,
            out_specs=out_specs,
        ),
        compiler_params=pltpu.CompilerParams(
            dimension_semantics=("parallel",),
        ),
        cost_estimate=pl.CostEstimate(
            flops=int(flops),
            transcendentals=int(b_pad * a_pad),
            bytes_accessed=int(bytes_accessed),
        ),
    )(s2d, *kparams)

    # Slice away batch / lane padding; return f32 to match the PyTorch module.
    return out[:batch, :action_dim].astype(jnp.float32), None


def init_actor_params(key, layer_num, state_dim, action_dim, hidden=128):
    """Deterministic parameter init (PyTorch-style uniform(-1/sqrt(fan_in), ...))."""
    dims = [state_dim] + [hidden] * (layer_num + 1) + [action_dim]
    params = []
    for i in range(len(dims) - 1):
        fan_in, fan_out = dims[i], dims[i + 1]
        key, kw, kb = jax.random.split(key, 3)
        bound = 1.0 / math.sqrt(fan_in)
        w = jax.random.uniform(kw, (fan_in, fan_out), jnp.float32, -bound, bound)
        b = jax.random.uniform(kb, (1, fan_out), jnp.float32, -bound, bound)
        params += [w, b]
    return params


def actor_reference(s, params, max_action):
    """Pure-JAX f32 reference for correctness checking."""
    x = s.reshape(s.shape[0], -1).astype(jnp.float32)
    n_linears = len(params) // 2
    for i in range(n_linears):
        w, b = params[2 * i], params[2 * i + 1]
        x = x @ w + b
        if i < n_linears - 1:
            x = jnp.maximum(x, 0.0)
    return max_action * jnp.tanh(x)


if __name__ == "__main__":
    # Shapes consistent with the module: state_shape=(4, 4) -> 16 features,
    # action_shape=(4,) -> 4 actions, layer_num=2 hidden layers.
    layer_num = 2
    state_shape = (4, 4)
    action_shape = (4,)
    max_action = 2.0

    state_dim = math.prod(state_shape)
    action_dim = math.prod(action_shape)

    key = jax.random.PRNGKey(0)
    params = init_actor_params(key, layer_num, state_dim, action_dim)

    # batch=32 exercises the 2-step grid (v7x dual-TC path); batch=5 exercises
    # batch padding with a single grid step.
    for batch in (32, 5):
        key, ks = jax.random.split(key)
        s = jax.random.normal(ks, (batch,) + state_shape, dtype=jnp.float32)

        logits, extra = actor_forward(s, params, max_action)
        logits = jax.block_until_ready(logits)

        ref = actor_reference(s, params, max_action)
        assert logits.shape == (batch, action_dim)
        assert extra is None
        # bf16 MXU inputs / bf16 activation-carry (v6e/v7x) or bf16 output
        # (v5e) -> loosened tolerance vs f32 reference.
        assert jnp.allclose(logits, ref, atol=5e-2, rtol=5e-2), "mismatch vs reference"

    print("KERNEL_OK")
</pallas_src>

<mosaic_0001>
module attributes {stable_mosaic.version = 11 : i64} {
  func.func @_actor_kernel(%arg0: i32, %arg1: memref<16x16xf32, #tpu.memory_space<vmem>>, %arg2: memref<16x128xf32, #tpu.memory_space<vmem>>, %arg3: memref<1x128xf32, #tpu.memory_space<vmem>>, %arg4: memref<128x128xbf16, #tpu.memory_space<vmem>>, %arg5: memref<1x128xf32, #tpu.memory_space<vmem>>, %arg6: memref<128x128xbf16, #tpu.memory_space<vmem>>, %arg7: memref<1x128xf32, #tpu.memory_space<vmem>>, %arg8: memref<128x128xbf16, #tpu.memory_space<vmem>>, %arg9: memref<1x128xf32, #tpu.memory_space<vmem>>, %arg10: memref<16x128xf32, #tpu.memory_space<vmem>>) attributes {dimension_semantics = [#tpu.dimension_semantics<parallel>], iteration_bounds = array<i64: 2>, scalar_prefetch = 0 : i64, scratch_operands = 0 : i64, tpu.core_type = #tpu.core_type<tc>, window_params = [{transform_indices = @transform_0, window_bounds = array<i64: 16, 16>}, {pipeline_mode = #tpu.pipeline_mode<synchronous>, transform_indices = @transform_1, window_bounds = array<i64: 16, 128>}, {pipeline_mode = #tpu.pipeline_mode<synchronous>, transform_indices = @transform_2, window_bounds = array<i64: 1, 128>}, {pipeline_mode = #tpu.pipeline_mode<synchronous>, transform_indices = @transform_3, window_bounds = array<i64: 128, 128>}, {pipeline_mode = #tpu.pipeline_mode<synchronous>, transform_indices = @transform_4, window_bounds = array<i64: 1, 128>}, {pipeline_mode = #tpu.pipeline_mode<synchronous>, transform_indices = @transform_5, window_bounds = array<i64: 128, 128>}, {pipeline_mode = #tpu.pipeline_mode<synchronous>, transform_indices = @transform_6, window_bounds = array<i64: 1, 128>}, {pipeline_mode = #tpu.pipeline_mode<synchronous>, transform_indices = @transform_7, window_bounds = array<i64: 128, 128>}, {pipeline_mode = #tpu.pipeline_mode<synchronous>, transform_indices = @transform_8, window_bounds = array<i64: 1, 128>}, {transform_indices = @transform_9, window_bounds = array<i64: 16, 128>}]} {
    %c0 = arith.constant 0 : index
    %c0_0 = arith.constant 0 : index
    %0 = vector.load %arg1[%c0, %c0_0] : memref<16x16xf32, #tpu.memory_space<vmem>>, vector<16x16xf32>
    %c0_1 = arith.constant 0 : index
    %c0_2 = arith.constant 0 : index
    %1 = vector.load %arg2[%c0_1, %c0_2] : memref<16x128xf32, #tpu.memory_space<vmem>>, vector<16x128xf32>
    %cst = arith.constant dense<0.000000e+00> : vector<16x128xf32>
    %2 = tpu.matmul %0, %1, %cst {dimension_numbers = #tpu.dot_dimension_numbers<[1], [0], [0], [1], [0, 0, 1, 1], [], []>} : vector<16x16xf32>, vector<16x128xf32>, vector<16x128xf32> -> vector<16x128xf32>
    %c0_3 = arith.constant 0 : index
    %c0_4 = arith.constant 0 : index
    %3 = vector.load %arg3[%c0_3, %c0_4] : memref<1x128xf32, #tpu.memory_space<vmem>>, vector<1x128xf32>
    %4 = vector.broadcast %3 : vector<1x128xf32> to vector<16x128xf32>
    %5 = arith.addf %2, %4 : vector<16x128xf32>
    %cst_5 = arith.constant 0.000000e+00 : f32
    %6 = vector.broadcast %cst_5 : f32 to vector<16x128xf32>
    %7 = arith.maximumf %5, %6 : vector<16x128xf32>
    %c0_6 = arith.constant 0 : index
    %c0_7 = arith.constant 0 : index
    %8 = vector.load %arg4[%c0_6, %c0_7] : memref<128x128xbf16, #tpu.memory_space<vmem>>, vector<128x128xbf16>
    %c0_8 = arith.constant 0 : index
    %c0_9 = arith.constant 0 : index
    %9 = vector.load %arg5[%c0_8, %c0_9] : memref<1x128xf32, #tpu.memory_space<vmem>>, vector<1x128xf32>
    %10 = arith.truncf %7 : vector<16x128xf32> to vector<16x128xbf16>
    %cst_10 = arith.constant dense<0.000000e+00> : vector<16x128xf32>
    %11 = tpu.matmul %10, %8, %cst_10 {dimension_numbers = #tpu.dot_dimension_numbers<[1], [0], [0], [1], [0, 0, 1, 1], [], []>} : vector<16x128xbf16>, vector<128x128xbf16>, vector<16x128xf32> -> vector<16x128xf32>
    %12 = vector.broadcast %9 : vector<1x128xf32> to vector<16x128xf32>
    %13 = arith.addf %11, %12 : vector<16x128xf32>
    %cst_11 = arith.constant 0.000000e+00 : f32
    %14 = vector.broadcast %cst_11 : f32 to vector<16x128xf32>
    %15 = arith.maximumf %13, %14 : vector<16x128xf32>
    %c0_12 = arith.constant 0 : index
    %c0_13 = arith.constant 0 : index
    %16 = vector.load %arg6[%c0_12, %c0_13] : memref<128x128xbf16, #tpu.memory_space<vmem>>, vector<128x128xbf16>
    %c0_14 = arith.constant 0 : index
    %c0_15 = arith.constant 0 : index
    %17 = vector.load %arg7[%c0_14, %c0_15] : memref<1x128xf32, #tpu.memory_space<vmem>>, vector<1x128xf32>
    %18 = arith.truncf %15 : vector<16x128xf32> to vector<16x128xbf16>
    %cst_16 = arith.constant dense<0.000000e+00> : vector<16x128xf32>
    %19 = tpu.matmul %18, %16, %cst_16 {dimension_numbers = #tpu.dot_dimension_numbers<[1], [0], [0], [1], [0, 0, 1, 1], [], []>} : vector<16x128xbf16>, vector<128x128xbf16>, vector<16x128xf32> -> vector<16x128xf32>
    %20 = vector.broadcast %17 : vector<1x128xf32> to vector<16x128xf32>
    %21 = arith.addf %19, %20 : vector<16x128xf32>
    %cst_17 = arith.constant 0.000000e+00 : f32
    %22 = vector.broadcast %cst_17 : f32 to vector<16x128xf32>
    %23 = arith.maximumf %21, %22 : vector<16x128xf32>
    %c0_18 = arith.constant 0 : index
    %c0_19 = arith.constant 0 : index
    %24 = vector.load %arg8[%c0_18, %c0_19] : memref<128x128xbf16, #tpu.memory_space<vmem>>, vector<128x128xbf16>
    %c0_20 = arith.constant 0 : index
    %c0_21 = arith.constant 0 : index
    %25 = vector.load %arg9[%c0_20, %c0_21] : memref<1x128xf32, #tpu.memory_space<vmem>>, vector<1x128xf32>
    %26 = arith.truncf %23 : vector<16x128xf32> to vector<16x128xbf16>
    %cst_22 = arith.constant dense<0.000000e+00> : vector<16x128xf32>
    %27 = tpu.matmul %26, %24, %cst_22 {dimension_numbers = #tpu.dot_dimension_numbers<[1], [0], [0], [1], [0, 0, 1, 1], [], []>} : vector<16x128xbf16>, vector<128x128xbf16>, vector<16x128xf32> -> vector<16x128xf32>
    %28 = vector.broadcast %25 : vector<1x128xf32> to vector<16x128xf32>
    %29 = arith.addf %27, %28 : vector<16x128xf32>
    %30 = math.tanh %29 : vector<16x128xf32>
    %cst_23 = arith.constant 2.000000e+00 : f32
    %31 = vector.broadcast %cst_23 : f32 to vector<16x128xf32>
    %32 = arith.mulf %31, %30 : vector<16x128xf32>
    %c0_24 = arith.constant 0 : index
    %c0_25 = arith.constant 0 : index
    %33 = vector.load %arg10[%c0_24, %c0_25] : memref<16x128xf32, #tpu.memory_space<vmem>>, vector<16x128xf32>
    tpu.vector_store %arg10[%c0_24, %c0_25], %32 {strides = array<i32>} : memref<16x128xf32, #tpu.memory_space<vmem>>, vector<16x128xf32>,
    return
  }
  func.func @transform_0(%arg0: i32) -> (i32, i32) {
    %c0_i32 = arith.constant 0 : i32
    %c0_i32_0 = arith.constant 0 : i32
    return %arg0, %c0_i32 : i32, i32
  }
  func.func @transform_1(%arg0: i32) -> (i32, i32) {
    %c0_i32 = arith.constant 0 : i32
    %c0_i32_0 = arith.constant 0 : i32
    %c0_i32_1 = arith.constant 0 : i32
    return %c0_i32, %c0_i32_0 : i32, i32
  }
  func.func @transform_2(%arg0: i32) -> (i32, i32) {
    %c0_i32 = arith.constant 0 : i32
    %c0_i32_0 = arith.constant 0 : i32
    %c0_i32_1 = arith.constant 0 : i32
    return %c0_i32, %c0_i32_0 : i32, i32
  }
  func.func @transform_3(%arg0: i32) -> (i32, i32) {
    %c0_i32 = arith.constant 0 : i32
    %c0_i32_0 = arith.constant 0 : i32
    %c0_i32_1 = arith.constant 0 : i32
    return %c0_i32, %c0_i32_0 : i32, i32
  }
  func.func @transform_4(%arg0: i32) -> (i32, i32) {
    %c0_i32 = arith.constant 0 : i32
    %c0_i32_0 = arith.constant 0 : i32
    %c0_i32_1 = arith.constant 0 : i32
    return %c0_i32, %c0_i32_0 : i32, i32
  }
  func.func @transform_5(%arg0: i32) -> (i32, i32) {
    %c0_i32 = arith.constant 0 : i32
    %c0_i32_0 = arith.constant 0 : i32
    %c0_i32_1 = arith.constant 0 : i32
    return %c0_i32, %c0_i32_0 : i32, i32
  }
  func.func @transform_6(%arg0: i32) -> (i32, i32) {
    %c0_i32 = arith.constant 0 : i32
    %c0_i32_0 = arith.constant 0 : i32
    %c0_i32_1 = arith.constant 0 : i32
    return %c0_i32, %c0_i32_0 : i32, i32
  }
  func.func @transform_7(%arg0: i32) -> (i32, i32) {
    %c0_i32 = arith.constant 0 : i32
    %c0_i32_0 = arith.constant 0 : i32
    %c0_i32_1 = arith.constant 0 : i32
    return %c0_i32, %c0_i32_0 : i32, i32
  }
  func.func @transform_8(%arg0: i32) -> (i32, i32) {
    %c0_i32 = arith.constant 0 : i32
    %c0_i32_0 = arith.constant 0 : i32
    %c0_i32_1 = arith.constant 0 : i32
    return %c0_i32, %c0_i32_0 : i32, i32
  }
  func.func @transform_9(%arg0: i32) -> (i32, i32) {
    %c0_i32 = arith.constant 0 : i32
    %c0_i32_0 = arith.constant 0 : i32
    return %arg0, %c0_i32 : i32, i32
  }
}

</mosaic_0001>

<bundles_post_ra>
// kernel: tpu_custom_call.1
= control target key start
LH: loop header
LB: loop body
LE: loop exit
PB: predicated region body
PF: predicated region fallthrough
CT: control target
= control target key end

     0   :  { %14 = vsyncpa [#allocation3], 0  ;;  %s1587_s0 = inlined_call_operand.vmem [shape: f32[32,16], index: 0, kind: input, shape index: {}]   ;;  %s1588_s1 = inlined_call_operand.vmem [shape: f32[16,128], index: 1, kind: input, shape index: {}]   ;;  %s1589_s2 = inlined_call_operand.vmem [shape: f32[1,128], index: 2, kind: input, shape index: {}]   ;;  %s1590_s3 = inlined_call_operand.hbm [shape: bf16[128,128], index: 3, kind: input, shape index: {}]   ;;  %s1591_s4 = inlined_call_operand.vmem [shape: f32[1,128], index: 4, kind: input, shape index: {}]   ;;  %s1592_s5 = inlined_call_operand.hbm [shape: bf16[128,128], index: 5, kind: input, shape index: {}]   ;;  %s1593_s6 = inlined_call_operand.vmem [shape: f32[1,128], index: 6, kind: input, shape index: {}]   ;;  %s1594_s7 = inlined_call_operand.hbm [shape: bf16[128,128], index: 7, kind: input, shape index: {}]   ;;  %s1595_s8 = inlined_call_operand.vmem [shape: f32[1,128], index: 8, kind: input, shape index: {}]   ;;  %s1596_s9 = inlined_call_operand.hbm [shape: f32[32,128], index: 9, kind: output, shape index: {}]  }
   0x1   :  { %15 = vsyncpa [#allocation6], 0 }
   0x2   :  { %16 = vsyncpa [#allocation4], 0 }
   0x3   :  { %18 = vsyncpa [#allocation4 + $0x1], 0  ;;  %s1389_s30 = smov 0   ;;  %s1391_s10 = smov 0  }
   0x4   :  { %s1393_s11 = smov 0   ;;  %s1395_s12 = smov 0  }
   0x5 LB: > { %s1410_s13 = sadd.s32 4294967295, %s1327_s12   ;;  %s930_s14 = sadd.s32 4294967294, %s1327_s12   ;;  %s1327_s12 = sphi %s1395_s12, %s1612_s12   ;;  %s1323_s11 = sphi %s1393_s11, %s1611_s11   ;;  %s1319_s10 = sphi %s1391_s10, %s1610_s10   ;;  %s1315_s30 = sphi %s1389_s30, %s1609_s30  }
   0x6   : > { %s1414_s15 = sadd.s32 1, %s1327_s12   ;;  %s225_s16 = sadd.s32 1, %s1323_s11 }
   0x7   : > { %s222_s17 = ssub.s32 %s1327_s12, %s1414_s15  ;;  %p235_p0 = scmp.ne.s32.totalorder %s1323_s11, %s1319_s10 }
   0x8   : > { %p223_p1 = scmp.eq.s32.totalorder %s222_s17, 0  ;;  %p236_p2 = scmp.eq.s32.totalorder %s1410_s13, 1 }
   0x9   : > { %p241_p3 = scmp.ne.s32.totalorder %s1319_s10, %s1315_s30  ;;  %p242_p4 = scmp.eq.s32.totalorder %s930_s14, 1 }
   0xa   : > { %s1425_s18 = scalar_select %p223_p1, %s1323_s11, %s225_s16  }
   0xb   : > { %p1427_p5 = por %p236_p2, %p235_p0  ;;  %p1431_p6 = por %p242_p4, %p241_p3 }
   0xc   : > { %p931_p7 = scmp.ge.s32.totalorder %s1327_s12, 1  ;;  %p249_p8 = scmp.lt.s32.totalorder %s1327_s12, 3 }
   0xd   : > { %s1599_s19 = scalar_select %p1427_p5, 1, 0 }
   0xe   : > { %s1600_s20 = scalar_select %p1431_p6, 1, 0 }
   0xf   : > { %p1597_p9 = scmp.eq.s32.totalorder %s1410_s13, 0  ;;  %p1438_p10 = pnand %p931_p7, %p249_p8 }
  0x10   : > { %s1329_s22 = smov [#allocation5]   ;;  %s1330_s25 = smov [#allocation2]  }
  0x11   : > { %p1091_p11 = pneg %p1438_p10  ;;  %s283_s23 = sshll.u32 %s1329_s22, 4  ;;  %s284_s23 = int_to_ptr.vmem [resolvable:$true] %s283_s23 }
  0x12   : > { %s267_s26 = sshll.u32 %s1330_s25, 4  ;;  %s1331_s27 = smov [#allocation7]   ;;  %s268_s26 = int_to_ptr.vmem [resolvable:$true] %s267_s26 }
  0x13   : > { %p1446_p12 = pnand %p1597_p9, %p1091_p11  ;;  %s299_s28 = sshll.u32 %s1331_s27, 4  ;;  %s300_s28 = int_to_ptr.vmem [resolvable:$true] %s299_s28 }
  0x14   : > { %s1192_s29 = scalar_lea.vmem %s284_s23, 1024  ;;  %p1200_p3 = scmp.lt.s32.totalorder %s284_s23, %s284_s23 }
  0x15   : > { %p1183_p13 = pneg %p1446_p12  ;;  %p1193_p0 = scmp.ne.s32.totalorder %s284_s23, %s1192_s29 }
  0x16   : > { %p1201_p4 = scmp.lt.s32.totalorder %s1192_s29, %s1192_s29 }
  0x17   : > { %p1195_p1 = pnand %p1193_p0, %p1183_p13 }
  0x18   : > { %p1202_p7 = por %p1201_p4, %p1200_p3 }
  0x19   : > { %p1196_p2 = pneg %p1195_p1 }
  0x1b   : > { %p1203_p8 = pnand %p1202_p7, %p1196_p2 }
  0x1d   : > { %1206 = shalt.err (!%p1203_p8)
}
  0x1e   : > { %s1332_s14 = smov 64   ;;  %s1333_s16 = smov 4  }
  0x1f   : > { %1097 = dma.hbm_to_vmem [thread:$0]  (!%p1446_p12), %s1592_s5, 1024, %s284_s23, [#allocation6], %s1332_s14, %s1332_s14, %s1333_s16  }
  0x20   : > { %s1218_s25 = scalar_lea.vmem %s268_s26, 1024  ;;  %p1226_p9 = scmp.lt.s32.totalorder %s268_s26, %s268_s26 }
  0x21   : > { %p1219_p11 = scmp.ne.s32.totalorder %s268_s26, %s1218_s25  ;;  %p1227_p6 = scmp.lt.s32.totalorder %s1218_s25, %s1218_s25 }
  0x23   : > { %p1221_p0 = pnand %p1219_p11, %p1183_p13  ;;  %p1228_p3 = por %p1227_p6, %p1226_p9 }
  0x25   : > { %p1222_p1 = pneg %p1221_p0 }
  0x27   : > { %p1229_p2 = pnand %p1228_p3, %p1222_p1 }
  0x29   : > { %1232 = shalt.err (!%p1229_p2)
}
  0x2a   : > { %1094 = dma.hbm_to_vmem [thread:$0]  (!%p1446_p12), %s1590_s3, 1024, %s268_s26, [#allocation3], %s1332_s14, %s1332_s14, %s1333_s16  }
  0x2b   : > { %s1244_s23 = scalar_lea.vmem %s300_s28, 1024  ;;  %p1252_p11 = scmp.lt.s32.totalorder %s300_s28, %s300_s28 }
  0x2c   : > { %p1245_p4 = scmp.ne.s32.totalorder %s300_s28, %s1244_s23  ;;  %p1253_p0 = scmp.lt.s32.totalorder %s1244_s23, %s1244_s23 }
  0x2e   : > { %p1247_p7 = pnand %p1245_p4, %p1183_p13  ;;  %p1254_p5 = por %p1253_p0, %p1252_p11 }
  0x30   : > { %p1248_p8 = pneg %p1247_p7 }
  0x32   : > { %p1255_p6 = pnand %p1254_p5, %p1248_p8 }
  0x34   : > { %1258 = shalt.err (!%p1255_p6)
}
  0x35   : > { %1100 = dma.hbm_to_vmem [thread:$0]  (!%p1446_p12), %s1594_s7, 1024, %s300_s28, [#allocation6], %s1332_s14, %s1332_s14, %s1333_s16  }
  0x36   : > { %327 = sbr.rel (%p1438_p10) target bundleno = 907 (0x38b), region = 56  ;;  %p1603_p9 = scmp.eq.s32.totalorder (!%p1438_p10), %s1410_s13, 0 }
  0x3b   : > { %1302 = dma.done.wait (%p1603_p9), [#allocation3], 1024   ;;  %p1604_p13 = pmov %p1603_p9 }
  0x3c   : > { %p1605_p1 = pmov %p1603_p9 }
  0x3d   : > { %1304 = vsyncadd (%p1604_p13), [#allocation3], 4294966272 }
  0x3e   : > { %1306 = dma.done.wait (%p1605_p1), [#allocation6], 2048   ;;  %p1606_p5 = pmov %p1605_p1 }
  0x3f   : > { %s941_s24 = sshll.u32 %s1410_s13, 1  ;;  %v1334_v0 = vmov 0.0   ;;  %vm390_vm0 = vcmask 130048   ;;  %v382_v1 = vld [vmem:[%s1588_s1 + $0x8] sm:$0xff]  ;;  %v381_v2 = vld [vmem:[%s1588_s1] sm:$0xff]  ;;  %v1153_v5 = vld [vmem:[#allocation2 + $0x38] sm:$0xff]  }
  0x40   : > { %1308 = vsyncadd (%p1606_p5), [#allocation6], 4294965248  ;;  %p372_p3 = scmp.lt.s32.totalorder %s941_s24, 3  ;;  %1017 = vmatprep.subr.bf16.mxu1 %v1334_v0  ;;  %1010 = vmatprep.subr.mxu0 %v382_v1  ;;  %v1154_v6 = vld [vmem:[#allocation2 + $0x30] sm:$0xff]   ;;  %v1155_v7 = vld [vmem:[#allocation2 + $0x28] sm:$0xff]   ;;  %vm1335_vm1 = vmmov 0  }
  0x41   : > { %1011 = vmatpush3.msra.mxu0 %v382_v1  ;;  %1018 = vmatpush3.bf16.msra.mxu1 %v1153_v5  ;;  %v1156_v8 = vld [vmem:[#allocation2 + $0x20] sm:$0xff]   ;;  %v1157_v9 = vld [vmem:[#allocation2 + $0x18] sm:$0xff]   ;;  %v1158_v10 = vld [vmem:[#allocation2 + $0x10] sm:$0xff]   ;;  %s368_s16 = sand.u32 1, %s1319_s10   ;;  %s978_s23 = sshll.u32 %s1410_s13, 8 }
  0x42   : > { %s1614_s24 = smov (!%p372_p3, %s941_s24), 3  ;;  %1012 = vmatprep.subr.mxu0 %v381_v2  ;;  %1019 = vmatprep.subr.bf16.mxu1 %v1334_v0  ;;  %v1159_v11 = vld [vmem:[#allocation2 + $0x8] sm:$0xff]   ;;  %v1160_v12 = vld [vmem:[#allocation2] sm:$0xff]   ;;  %v1161_v13 = vld [vmem:[#allocation5 + $0x38] sm:$0xff]   ;;  %s940_s25 = sshll.u32 %s368_s16, 4 }
  0x43   : > { %s942_s21 = sshll.u32 %s1614_s24, 3  ;;  %1013 = vmatpush3.msra.mxu0 %v381_v2  ;;  %1033 = vmatprep.mubr.msk.bf16.mxu1 %vm1335_vm1, %v1334_v0  ;;  %v1162_v14 = vld [vmem:[#allocation5 + $0x30] sm:$0xff]   ;;  %v1163_v15 = vld [vmem:[#allocation5 + $0x28] sm:$0xff]   ;;  %v1164_v16 = vld [vmem:[#allocation5 + $0x20] sm:$0xff]   ;;  %s370_s27 = scalar_lea.vmem [#allocation8], %s940_s25 }
  0x44   : > { %s375_s14 = scalar_lea.vmem %s1587_s0, %s942_s21  ;;  %1037 = vmatprep.subr.bf16.mxu0 %v1334_v0  ;;  %v1165_v17 = vld [vmem:[#allocation5 + $0x18] sm:$0xff]   ;;  %v943_v18 = vld [vmem:[%s1589_s2] ss:$0 sm:$0xff]  ;;  %v1166_v26 = vld [vmem:[#allocation5 + $0x10] sm:$0xff]   ;;  %s837_s29 = sshll.u32 %s370_s27, 4  ;;  %s1540_s29 = int_to_ptr.vmem [resolvable:$true] %s837_s29 }
  0x45   : > { %v379_v3 = vld [vmem:[%s375_s14] sm:$0xff]  ;;  %v380_v4 = vld [vmem:[%s375_s14 + $0x8] sm:$0xff]  ;;  %1020 = vmatpush3.bf16.msra.mxu1 %v1154_v6  ;;  %v1169_v29 = vld [vmem:[#allocation7 + $0x38] sm:$0xff]   ;;  %s1545_s24 = scalar_lea.hbm %s1596_s9, %s978_s23  ;;  %s1547_s21 = scalar_lea.sflag [#allocation4], %s368_s16 }
  0x46   : > { %1014 = vmatprep.mubr.msk.f32.mxu0 %vm390_vm0, %v379_v3  ;;  %1021 = vmatprep.subr.bf16.mxu1 %v1334_v0  ;;  %v1167_v27 = vld [vmem:[#allocation5 + $0x8] sm:$0xff]   ;;  %v1168_v28 = vld [vmem:[#allocation5] sm:$0xff]   ;;  %v1170_v30 = vld [vmem:[#allocation7 + $0x30] sm:$0xff]   ;;  %s1259_s26 = scalar_lea.vmem %s1540_s29, 256  ;;  %p1607_p12 = scmp.ne.s32.totalorder %s1599_s19, 0 }
  0x47   : > { %1015 = vmatmul.mubr.msk.f32.vlgmr.msra.gmra.mxu0 %vm390_vm0, %v380_v4  ;;  %v1171_v31 = vld [vmem:[#allocation7 + $0x28] sm:$0xff]   ;;  %v1172_v32 = vld [vmem:[#allocation7 + $0x20] sm:$0xff]   ;;  %v1173_v33 = vld [vmem:[#allocation7 + $0x18] sm:$0xff]   ;;  %p1260_p10 = scmp.ne.s32.totalorder %s1540_s29, %s1259_s26  ;;  %s1336_s13 = smov [#allocation8]  }
  0x48   : > { %1053 = vmatprep.mubr.msk.bf16.mxu0 %vm1335_vm1, %v1334_v0  ;;  %1038 = vmatpush3.bf16.msra.mxu0 %v1161_v13  ;;  %v946_v34 = vld [vmem:[%s1591_s4] ss:$0 sm:$0xff]  ;;  %v1174_v44 = vld [vmem:[#allocation7 + $0x10] sm:$0xff]   ;;  %v1175_v45 = vld [vmem:[#allocation7 + $0x8] sm:$0xff]   ;;  %s1263_s28 = sshll.u32 %s1336_s13, 4  ;;  %s1264_s28 = int_to_ptr.vmem [resolvable:$false] %s1263_s28 }
  0x49   : > { %1022 = vmatpush3.bf16.msra.mxu1 %v1155_v7  ;;  %1039 = vmatprep.subr.bf16.mxu0 %v1334_v0  ;;  %v1176_v46 = vld [vmem:[#allocation7] sm:$0xff]   ;;  %p1261_p2 = pnand %p1260_p10, %p1607_p12  ;;  %s1265_s14 = scalar_lea.vmem %s1264_s28, 512 }
  0x4a   : > { %1023 = vmatprep.subr.bf16.mxu1 %v1334_v0  ;;  %v955_v47 = vld [vmem:[%s1593_s6] ss:$0 sm:$0xff]  ;;  %p1266_p7 = scmp.lt.s32.totalorder %s1540_s29, %s1264_s28  ;;  %p1267_p8 = scmp.lt.s32.totalorder %s1265_s14, %s1259_s26 }
  0x4b   : > { %v964_v57 = vld [vmem:[%s1595_s8] ss:$0 sm:$0xff]  ;;  %p1262_p4 = pneg %p1261_p2 }
  0x4c   : > { %1040 = vmatpush3.bf16.msra.mxu0 %v1162_v14  ;;  %p1268_p11 = por %p1267_p8, %p1266_p7 }
  0x4d   : > { %1024 = vmatpush3.bf16.msra.mxu1 %v1156_v8  ;;  %1041 = vmatprep.subr.bf16.mxu0 %v1334_v0 }
  0x4e   : > { %1025 = vmatprep.subr.bf16.mxu1 %v1334_v0  ;;  %p1269_p0 = pnand %p1268_p11, %p1262_p4 }
  0x50   : > { %1042 = vmatpush3.bf16.msra.mxu0 %v1163_v15 }
  0x51   : > { %1026 = vmatpush3.bf16.msra.mxu1 %v1157_v9  ;;  %1043 = vmatprep.subr.bf16.mxu0 %v1334_v0 }
  0x52   : > { %1027 = vmatprep.subr.bf16.mxu1 %v1334_v0 }
  0x54   : > { %1044 = vmatpush3.bf16.msra.mxu0 %v1164_v16 }
  0x55   : > { %1028 = vmatpush3.bf16.msra.mxu1 %v1158_v10  ;;  %1045 = vmatprep.subr.bf16.mxu0 %v1334_v0 }
  0x56   : > { %1029 = vmatprep.subr.bf16.mxu1 %v1334_v0 }
  0x58   : > { %1046 = vmatpush3.bf16.msra.mxu0 %v1165_v17 }
  0x59   : > { %1030 = vmatpush3.bf16.msra.mxu1 %v1159_v11  ;;  %1047 = vmatprep.subr.bf16.mxu0 %v1334_v0 }
  0x5a   : > { %1031 = vmatprep.subr.bf16.mxu1 %v1334_v0 }
  0x5c   : > { %1048 = vmatpush3.bf16.msra.mxu0 %v1166_v26 }
  0x5d   : > { %1032 = vmatpush3.bf16.msra.mxu1 %v1160_v12  ;;  %1049 = vmatprep.subr.bf16.mxu0 %v1334_v0 }
  0x5e   : > { %1057 = vmatprep.subr.bf16.mxu1 %v1334_v0 }
  0x60   : > { %1050 = vmatpush3.bf16.msra.mxu0 %v1167_v27 }
  0x61   : > { %1051 = vmatprep.subr.bf16.mxu0 %v1334_v0 }
  0x64   : > { %1052 = vmatpush3.bf16.msra.mxu0 %v1168_v28 }
 0x107   : > { %v1016_v19 = vpop.f32.mrf.mxu0 }
 0x108   : > { %v469_v20 = vadd.f32 %v1016_v19, %v943_v18 }
 0x109   : > { %v463_v21 = vpop.f32.mrf.mxu0 }
 0x10a   : > { %v464_v22 = vadd.f32 %v943_v18, %v463_v21  ;;  %v473_v23 = vmax.f32 %v469_v20, 0.0 }
 0x10c   : > { %v472_v24 = vmax.f32 %v464_v22, 0.0 }
 0x10e   : > { %v491_v25 = vpack.c.bf16 %v473_v23, %v472_v24 }
 0x110   : > { %1034 = vmatmul.mubr.bf16.vlgmr.msra.gmra.mxu1 %v491_v25 }
 0x111   : > { %1073 = vmatprep.mubr.msk.bf16.mxu1 %vm1335_vm1, %v1334_v0  ;;  %1058 = vmatpush3.bf16.msra.mxu1 %v1169_v29 }
 0x112   : > { %1059 = vmatprep.subr.bf16.mxu1 %v1334_v0 }
 0x115   : > { %1060 = vmatpush3.bf16.msra.mxu1 %v1170_v30 }
 0x116   : > { %1061 = vmatprep.subr.bf16.mxu1 %v1334_v0 }
 0x119   : > { %1062 = vmatpush3.bf16.msra.mxu1 %v1171_v31 }
 0x11a   : > { %1063 = vmatprep.subr.bf16.mxu1 %v1334_v0 }
 0x11d   : > { %1064 = vmatpush3.bf16.msra.mxu1 %v1172_v32 }
 0x11e   : > { %1065 = vmatprep.subr.bf16.mxu1 %v1334_v0 }
 0x121   : > { %1066 = vmatpush3.bf16.msra.mxu1 %v1173_v33 }
 0x122   : > { %1067 = vmatprep.subr.bf16.mxu1 %v1334_v0 }
 0x125   : > { %1068 = vmatpush3.bf16.msra.mxu1 %v1174_v44 }
 0x126   : > { %1069 = vmatprep.subr.bf16.mxu1 %v1334_v0 }
 0x129   : > { %1070 = vmatpush3.bf16.msra.mxu1 %v1175_v45 }
 0x12a   : > { %1071 = vmatprep.subr.bf16.mxu1 %v1334_v0 }
 0x12d   : > { %1072 = vmatpush3.bf16.msra.mxu1 %v1176_v46 }
 0x1d0   : > { %v580_v35 = vpop.f32.mrf.mxu1 }
 0x1d1   : > { %v581_v37 = vadd.f32 %v946_v34, %v580_v35 }
 0x1d2   : > { %v1035_v36 = vpop.f32.mrf.mxu1 }
 0x1d3   : > { %v587_v41 = vmax.f32 %v581_v37, 0.0 }
 0x1d4   : > { %v583_v38 = vpop.f32.mrf.mxu1 }
 0x1d5   : > { %v584_v39 = vadd.f32 %v946_v34, %v583_v38 }
 0x1d6   : > { %v1036_v40 = vpop.f32.mrf.mxu1 }
 0x1d7   : > { %v588_v42 = vmax.f32 %v584_v39, 0.0 }
 0x1d9   : > { %v606_v43 = vpack.c.bf16 %v588_v42, %v587_v41 }
 0x1db   : > { %1054 = vmatmul.mubr.bf16.vlgmr.msra.gmra.mxu0 %v606_v43 }
 0x29b   : > { %v695_v48 = vpop.f32.mrf.mxu0 }
 0x29c   : > { %v696_v50 = vadd.f32 %v955_v47, %v695_v48 }
 0x29d   : > { %v1055_v49 = vpop.f32.mrf.mxu0 }
 0x29e   : > { %v702_v54 = vmax.f32 %v696_v50, 0.0 }
 0x29f   : > { %v698_v51 = vpop.f32.mrf.mxu0 }
 0x2a0   : > { %v699_v52 = vadd.f32 %v955_v47, %v698_v51 }
 0x2a1   : > { %v1056_v53 = vpop.f32.mrf.mxu0 }
 0x2a2   : > { %v703_v55 = vmax.f32 %v699_v52, 0.0 }
 0x2a4   : > { %v721_v56 = vpack.c.bf16 %v703_v55, %v702_v54 }
 0x2a6   : > { %1074 = vmatmul.mubr.bf16.vlgmr.msra.gmra.mxu1 %v721_v56 }
 0x366   : > { %v810_v58 = vpop.f32.mrf.mxu1 }
 0x367   : > { %v811_v59 = vadd.f32 %v964_v57, %v810_v58 }
 0x368   : > { %v1075_v60 = vpop.f32.mrf.mxu1 }
 0x369   : > { %1177 = vtanh.f32 %v811_v59 }
 0x36a   : > { %v813_v61 = vpop.f32.mrf.mxu1 }
 0x36b   : > { %v814_v62 = vadd.f32 %v964_v57, %v813_v61 }
 0x36c   : > { %v1076_v63 = vpop.f32.mrf.mxu1 }
 0x36d   : > { %1179 = vtanh.f32 %v814_v62 }
 0x376   : > { %v1178_v0 = vpop.eup %1177 }
 0x377   : > { %v819_v1 = vmul.f32 2.0, %v1178_v0 }
 0x379   : > { %821 = vst [vmem:[%s370_s27] sm:$0xff] %v819_v1 }
 0x37a   : > { %v1180_v2 = vpop.eup %1179 }
 0x37b   : > { %v820_v3 = vmul.f32 2.0, %v1180_v2 }
 0x37d   : > { %822 = vst [vmem:[%s370_s27 + $0x8] sm:$0xff] %v820_v3 }
 0x37e   : > { %1272 = shalt.err (!%p1269_p0)
}
 0x37f   : > { %s1273_s16 = scalar_lea.hbm %s1545_s24, 256  ;;  %s1277_s23 = scalar_lea.hbm %s1596_s9, 512 }
 0x380   : > { %p1274_p6 = scmp.ne.s32.totalorder %s1545_s24, %s1273_s16  ;;  %p1278_p1 = scmp.lt.s32.totalorder %s1545_s24, %s1596_s9 }
 0x381   : > { %p1279_p5 = scmp.lt.s32.totalorder %s1277_s23, %s1273_s16 }
 0x382   : > { %p1275_p9 = pnand %p1274_p6, %p1607_p12 }
 0x383   : > { %p1280_p3 = por %p1279_p5, %p1278_p1 }
 0x384   : > { %p1276_p13 = pneg %p1275_p9 }
 0x386   : > { %p1281_p10 = pnand %p1280_p3, %p1276_p13 }
 0x388   : > { %1284 = shalt.err (!%p1281_p10)
}
 0x389   : > { %s1337_s26 = smov 128   ;;  %s1338_s13 = smov 8  }
 0x38a   : > { %1089 = dma.vmem_to_hbm [thread:$0]  (%p1607_p12), %s1540_s29, 256, %s1545_s24, %s1547_s21, %s1337_s26, %s1337_s26, %s1338_s13  }
 0x38b PF: > { %p1111_p2 = scmp.ge.s32.totalorder %s1327_s12, 2  ;;  %s852_s28 = sand.u32 1, %s1315_s30  }
 0x38c   : > { %p1608_p4 = scmp.ne.s32.totalorder %s1600_s20, 0  ;;  %s853_s14 = scalar_lea.sflag [#allocation4], %s852_s28 }
 0x38e   : > { %p1102_p7 = pnand %p1111_p2, %p1608_p4 }
 0x390   : > { %p1103_p8 = pneg %p1102_p7 }
 0x392   : > { %1310 = dma.done.wait (%p1103_p8), %s853_s14, 256  }
 0x393   : > { %1312 = vsyncadd (%p1103_p8), %s853_s14, 4294967040  ;;  %p21_p11 = scmp.ge.s32.totalorder %s1414_s15, 4   ;;  %s1609_s30 = smov %s1319_s10 }
 0x394   : > { %s1610_s10 = smov %s1323_s11  ;;  %s1611_s11 = smov %s1425_s18 }
 0x395   : > { %s1612_s12 = smov %s1414_s15  ;;  %23 = sbr.rel (!%p21_p11) target bundleno = 5 (0x5), region = 104 }
 0x39a   :  { %858 = vsyncpa [#allocation3], 1 }
 0x39b   :  { %860 = vsyncpa [#allocation3 + $0x1], 1 }
 0x39c   :  { %861 = vsyncpa [#allocation6], 1 }
 0x39d   :  { %862 = vsyncpa [#allocation4], 1 }
 0x39e   :  { %864 = vsyncpa [#allocation4 + $0x1], 1 }

</bundles_post_ra>
